<compile_context>
chip_gen: v7x
topology: tpu7x:2x2x1
jax: 0.10.0
libtpu: 0.0.40
codegen_flags: <defaults>
</compile_context>

<pallas_src>
import jax
import jax.numpy as jnp
from jax import lax
from jax.experimental import pallas as pl
from jax.experimental.pallas import tpu as pltpu


def _force_pair(v):
    if isinstance(v, tuple):
        if len(v) != 2:
            raise ValueError(v)
        return (int(v[0]), int(v[1]))
    return (int(v), int(v))


def _ceil_div(a, b):
    return -(-a // b)


def _vmem_limit_bytes(default=32 * 1024 * 1024):
    """~3/4 of physical VMEM: ~96 MiB on v5e/v6e (128 MiB), ~48 MiB on v7x (64 MiB)."""
    try:
        info = pltpu.get_tpu_info()
        cap = int(getattr(info, "vmem_capacity_bytes", 0)
                  or getattr(info, "vmem_size_bytes", 0) or 0)
        if cap > 0:
            return int(min((cap * 3) // 4, 96 * 1024 * 1024))
    except Exception:
        pass
    return default


def _make_kernel(kH, kW, sh, sw, Wq, Cout, Mrows, HqWq, acc_rows, n_phase):
    def kernel(x_ref, w_ref, o_ref, g_ref, acc_ref):
        # x_ref:   (Cin, Mrows)              one image, K-major, flat spatial in lanes
        # w_ref:   (kH, kW*Cout, Cin)        packed weights (one LHS per kernel row)
        # o_ref:   (n_phase, Cout, HqWq)     phase-major, lane-dense output
        # g_ref:   (kW*Cout, Mrows) f32      per-kh GEMM result scratch
        # acc_ref: (n_phase, Cout, acc_rows) f32  overlap-add accumulator
        if acc_rows > Mrows:
            # Zero only the bottom-halo / bleed lanes; everything else is
            # initialised by the first (offset-0) tap of each phase writing `=`.
            acc_ref[:, :, Mrows:] = jnp.zeros(
                (n_phase, Cout, acc_rows - Mrows), jnp.float32)

        for kh in range(kH):
            # One lane-dense GEMM per kernel row: (kW*Cout, Cin) @ (Cin, Mrows).
            g_ref[...] = jnp.dot(w_ref[kh], x_ref[...],
                                 preferred_element_type=jnp.float32)
            dh, rh = kh // sh, kh % sh
            for kw in range(kW):
                dw, rw = kw // sw, kw % sw
                r = rh * sw + rw                      # output phase
                off = dh * Wq + dw                    # constant lane shift
                blk = g_ref[kw * Cout:(kw + 1) * Cout, :]
                if kh < sh and kw < sw:               # first tap of this phase (off == 0)
                    acc_ref[r, :, 0:Mrows] = blk
                else:
                    acc_ref[r, :, off:off + Mrows] += blk

        for r in range(n_phase):
            rh, rw = r // sw, r % sw
            if rh < kH and rw < kW:
                o_ref[r] = acc_ref[r, :, :HqWq].astype(o_ref.dtype)
            else:                                     # stride > kernel: phase has no taps
                o_ref[r] = jnp.zeros((Cout, HqWq), o_ref.dtype)

    return kernel


def conv_transpose2d_pallas(x, weight, stride=1, padding=0, *,
                            compute_dtype=jnp.bfloat16):
    """x: (B, Cin, H, W) NCHW; weight: (Cin, Cout, kH, kW). Returns (B, Cout, OH, OW).

    compute_dtype: dtype of the GEMM operands (default bf16, MXU-native);
    accumulation is always f32. Pass jnp.float32 (or None) for exact arithmetic.
    """
    sh, sw = _force_pair(stride)
    ph, pw = _force_pair(padding)
    B, Cin, H, W = map(int, x.shape)
    Cin_w, Cout, kH, kW = map(int, weight.shape)
    assert Cin == Cin_w
    assert ph >= 0 and pw >= 0
    OH = (H - 1) * sh - 2 * ph + kH
    OW = (W - 1) * sw - 2 * pw + kW
    assert OH > 0 and OW > 0, "output spatial size must be positive"

    # Per-phase tap extents (how far a tap can shift the per-phase output grid).
    m_h = _ceil_div(kH, sh) - 1
    m_w = _ceil_div(kW, sw) - 1
    Hq, Wq = H + m_h, W + m_w          # per-phase output extent before final crop
    n_phase = sh * sw
    Mrows = H * Wq                     # flat spatial (W right-padded) = GEMM N dim
    HqWq = Hq * Wq
    acc_rows = HqWq + m_w              # +m_w: zero "bleed" lanes from the W pad

    # Input stays NCHW: just right-pad W by m_w and flatten spatial into lanes.
    x_flat = jnp.pad(x, ((0, 0), (0, 0), (0, 0), (0, m_w))).reshape(B, Cin, Mrows)
    # Packed weights (kH, kW*Cout, Cin); row within a kh group = kw*Cout + co.
    w_pack = jnp.transpose(weight, (2, 3, 1, 0)).reshape(kH, kW * Cout, Cin)

    if compute_dtype is not None:
        x_flat = x_flat.astype(compute_dtype)
        w_pack = w_pack.astype(compute_dtype)

    kernel = _make_kernel(kH, kW, sh, sw, Wq, Cout, Mrows, HqWq, acc_rows, n_phase)

    out_dtype = x.dtype
    cost = pl.CostEstimate(
        flops=int(2 * B * Mrows * Cin * kH * kW * Cout),
        transcendentals=0,
        bytes_accessed=int(x_flat.size * x_flat.dtype.itemsize
                           + w_pack.size * w_pack.dtype.itemsize
                           + B * n_phase * Cout * HqWq * jnp.dtype(out_dtype).itemsize))

    out_p = pl.pallas_call(
        kernel,
        out_shape=jax.ShapeDtypeStruct((B, n_phase, Cout, HqWq), out_dtype),
        grid_spec=pltpu.PrefetchScalarGridSpec(
            num_scalar_prefetch=0,
            grid=(B,),
            in_specs=[
                pl.BlockSpec((None, Cin, Mrows), lambda b: (b, 0, 0)),
                # Grid-invariant weights.
                # TODO(synk): single-buffer via pipeline_mode=pl.Buffered(1) once
                # it is safe across all deployed jax versions (VMEM saving only).
                pl.BlockSpec((kH, kW * Cout, Cin), lambda b: (0, 0, 0)),
            ],
            out_specs=pl.BlockSpec((None, n_phase, Cout, HqWq),
                                   lambda b: (b, 0, 0, 0)),
            scratch_shapes=[
                pltpu.VMEM((kW * Cout, Mrows), jnp.float32),     # per-kh GEMM result
                pltpu.VMEM((n_phase, Cout, acc_rows), jnp.float32),  # accumulator
            ],
        ),
        compiler_params=pltpu.CompilerParams(
            dimension_semantics=("parallel",),
            vmem_limit_bytes=_vmem_limit_bytes(),
        ),
        cost_estimate=cost,
    )(x_flat, w_pack)

    # TODO(synk): for very large feature maps, add an H-band grid axis with an
    # m_h-row halo so Mrows-sized blocks stay inside v7x's 64 MiB VMEM.

    # Interleave the sh*sw phases and crop -> NCHW (single fused XLA pass).
    y = out_p.reshape(B, sh, sw, Cout, Hq, Wq)
    y = jnp.transpose(y, (0, 3, 4, 1, 5, 2))          # (B, Cout, Hq, sh, Wq, sw)
    y = y.reshape(B, Cout, Hq * sh, Wq * sw)
    return y[:, :, ph:ph + OH, pw:pw + OW]


class ConvTranspose2d:
    """Same semantics as torch.nn.ConvTranspose2d with bias=False
    (no output_padding / dilation / groups, matching the reference module)."""

    def __init__(self, in_channels, out_channels, kernel_size, stride=1, padding=0, *, key):
        self.in_channels = in_channels
        self.out_channels = out_channels
        self.stride = stride
        self.padding = padding
        kH, kW = _force_pair(kernel_size)
        k = out_channels * kH * kW
        sf = 1.0 / (k ** 0.5)
        self.weight = jax.random.uniform(
            key, (in_channels, out_channels, kH, kW), jnp.float32, minval=-sf, maxval=sf
        )

    def __call__(self, x):
        return conv_transpose2d_pallas(x, self.weight, self.stride, self.padding)


def _reference_conv_transpose2d(x, weight, stride, padding):
    """Pure-XLA reference: transposed conv == lhs-dilated conv with flipped kernel."""
    sh, sw = _force_pair(stride)
    ph, pw = _force_pair(padding)
    _, _, kH, kW = weight.shape
    w_conv = jnp.transpose(weight, (1, 0, 2, 3))[:, :, ::-1, ::-1]  # (Cout, Cin, kH, kW)
    return lax.conv_general_dilated(
        x, w_conv, window_strides=(1, 1),
        padding=[(kH - 1 - ph, kH - 1 - ph), (kW - 1 - pw, kW - 1 - pw)],
        lhs_dilation=(sh, sw),
        dimension_numbers=("NCHW", "OIHW", "NCHW"),
    )


if __name__ == "__main__":
    key = jax.random.PRNGKey(0)
    k_x, k_w, k_x2, k_w2, k_x3, k_w3 = jax.random.split(key, 6)

    # 1) Typical DCGAN upsampling block, default bf16 GEMM operands.
    B, Cin, H, W = 2, 4, 16, 16
    Cout, ksize, stride, padding = 8, 4, 2, 1
    x = jax.random.normal(k_x, (B, Cin, H, W), jnp.float32)
    module = ConvTranspose2d(Cin, Cout, ksize, stride=stride, padding=padding, key=k_w)
    out = jax.block_until_ready(module(x))
    ref = _reference_conv_transpose2d(x, module.weight, stride, padding)
    assert out.shape == ref.shape, (out.shape, ref.shape)
    assert jnp.allclose(out, ref, rtol=5e-2, atol=5e-2), float(jnp.max(jnp.abs(out - ref)))

    # 1b) Same case with f32 operands -> strict tolerance (algorithm check).
    out_f32 = jax.block_until_ready(conv_transpose2d_pallas(
        x, module.weight, stride, padding, compute_dtype=jnp.float32))
    assert jnp.allclose(out_f32, ref, rtol=1e-5, atol=1e-5), \
        float(jnp.max(jnp.abs(out_f32 - ref)))

    # 2) Kernel size not divisible by stride, no padding.
    x2 = jax.random.normal(k_x2, (2, 4, 8, 8), jnp.float32)
    w2 = 0.1 * jax.random.normal(k_w2, (4, 8, 3, 3), jnp.float32)
    out2 = jax.block_until_ready(conv_transpose2d_pallas(
        x2, w2, stride=2, padding=0, compute_dtype=jnp.float32))
    ref2 = _reference_conv_transpose2d(x2, w2, 2, 0)
    assert out2.shape == ref2.shape, (out2.shape, ref2.shape)
    assert jnp.allclose(out2, ref2, rtol=1e-5, atol=1e-5), \
        float(jnp.max(jnp.abs(out2 - ref2)))

    # 3) Stride larger than kernel (phases with no taps, zero-halo path).
    x3 = jax.random.normal(k_x3, (2, 4, 8, 8), jnp.float32)
    w3 = 0.1 * jax.random.normal(k_w3, (4, 8, 2, 2), jnp.float32)
    out3 = jax.block_until_ready(conv_transpose2d_pallas(
        x3, w3, stride=3, padding=0, compute_dtype=jnp.float32))
    ref3 = _reference_conv_transpose2d(x3, w3, 3, 0)
    assert out3.shape == ref3.shape, (out3.shape, ref3.shape)
    assert jnp.allclose(out3, ref3, rtol=1e-5, atol=1e-5), \
        float(jnp.max(jnp.abs(out3 - ref3)))

    print("KERNEL_OK")
</pallas_src>

<mosaic_0001>
module attributes {stable_mosaic.version = 11 : i64} {
  func.func @kernel(%arg0: i32, %arg1: memref<1x4x272xbf16, #tpu.memory_space<vmem>>, %arg2: memref<4x32x4xbf16, #tpu.memory_space<vmem>>, %arg3: memref<1x4x8x289xf32, #tpu.memory_space<vmem>>, %arg4: memref<32x272xf32, #tpu.memory_space<vmem>>, %arg5: memref<4x8x290xf32, #tpu.memory_space<vmem>>) attributes {dimension_semantics = [#tpu.dimension_semantics<parallel>], iteration_bounds = array<i64: 2>, scalar_prefetch = 0 : i64, scratch_operands = 2 : i64, tpu.core_type = #tpu.core_type<tc>, window_params = [{transform_indices = @transform_0, window_bounds = array<i64: 1, 4, 272>}, {pipeline_mode = #tpu.pipeline_mode<synchronous>, transform_indices = @transform_1, window_bounds = array<i64: 4, 32, 4>}, {transform_indices = @transform_2, window_bounds = array<i64: 1, 4, 8, 289>}]} {
    %cst = arith.constant 0.000000e+00 : f32
    %0 = vector.broadcast %cst : f32 to vector<4x8x18xf32>
    %c0 = arith.constant 0 : index
    %c0_0 = arith.constant 0 : index
    %c272 = arith.constant 272 : index
    %1 = vector.load %arg5[%c0, %c0_0, %c272] : memref<4x8x290xf32, #tpu.memory_space<vmem>>, vector<4x8x18xf32>
    tpu.vector_store %arg5[%c0, %c0_0, %c272], %0 {strides = array<i32>} : memref<4x8x290xf32, #tpu.memory_space<vmem>>, vector<4x8x18xf32>,
    %c0_1 = arith.constant 0 : index
    %c0_2 = arith.constant 0 : index
    %c0_3 = arith.constant 0 : index
    %2 = vector.load %arg2[%c0_1, %c0_2, %c0_3] : memref<4x32x4xbf16, #tpu.memory_space<vmem>>, vector<1x32x4xbf16>
    %3 = vector.shape_cast %2 : vector<1x32x4xbf16> to vector<32x4xbf16>
    %c0_4 = arith.constant 0 : index
    %c0_5 = arith.constant 0 : index
    %c0_6 = arith.constant 0 : index
    %4 = vector.load %arg1[%c0_4, %c0_5, %c0_6] : memref<1x4x272xbf16, #tpu.memory_space<vmem>>, vector<1x4x272xbf16>
    %5 = vector.shape_cast %4 : vector<1x4x272xbf16> to vector<4x272xbf16>
    %cst_7 = arith.constant dense<0.000000e+00> : vector<32x272xf32>
    %6 = tpu.matmul %3, %5, %cst_7 {dimension_numbers = #tpu.dot_dimension_numbers<[1], [0], [0], [1], [0, 0, 1, 1], [], []>} : vector<32x4xbf16>, vector<4x272xbf16>, vector<32x272xf32> -> vector<32x272xf32>
    %c0_8 = arith.constant 0 : index
    %c0_9 = arith.constant 0 : index
    %7 = vector.load %arg4[%c0_8, %c0_9] : memref<32x272xf32, #tpu.memory_space<vmem>>, vector<32x272xf32>
    tpu.vector_store %arg4[%c0_8, %c0_9], %6 {strides = array<i32>} : memref<32x272xf32, #tpu.memory_space<vmem>>, vector<32x272xf32>,
    %c0_10 = arith.constant 0 : index
    %c0_11 = arith.constant 0 : index
    %8 = vector.load %arg4[%c0_10, %c0_11] : memref<32x272xf32, #tpu.memory_space<vmem>>, vector<8x272xf32>
    %c0_12 = arith.constant 0 : index
    %c0_13 = arith.constant 0 : index
    %c0_14 = arith.constant 0 : index
    %9 = vector.load %arg5[%c0_12, %c0_13, %c0_14] : memref<4x8x290xf32, #tpu.memory_space<vmem>>, vector<1x8x272xf32>
    %10 = vector.shape_cast %9 : vector<1x8x272xf32> to vector<8x272xf32>
    %11 = vector.shape_cast %8 : vector<8x272xf32> to vector<1x8x272xf32>
    tpu.vector_store %arg5[%c0_12, %c0_13, %c0_14], %11 {strides = array<i32>} : memref<4x8x290xf32, #tpu.memory_space<vmem>>, vector<1x8x272xf32>,
    %c8 = arith.constant 8 : index
    %c0_15 = arith.constant 0 : index
    %12 = vector.load %arg4[%c8, %c0_15] : memref<32x272xf32, #tpu.memory_space<vmem>>, vector<8x272xf32>
    %c1 = arith.constant 1 : index
    %c0_16 = arith.constant 0 : index
    %c0_17 = arith.constant 0 : index
    %13 = vector.load %arg5[%c1, %c0_16, %c0_17] : memref<4x8x290xf32, #tpu.memory_space<vmem>>, vector<1x8x272xf32>
    %14 = vector.shape_cast %13 : vector<1x8x272xf32> to vector<8x272xf32>
    %15 = vector.shape_cast %12 : vector<8x272xf32> to vector<1x8x272xf32>
    tpu.vector_store %arg5[%c1, %c0_16, %c0_17], %15 {strides = array<i32>} : memref<4x8x290xf32, #tpu.memory_space<vmem>>, vector<1x8x272xf32>,
    %c16 = arith.constant 16 : index
    %c0_18 = arith.constant 0 : index
    %16 = vector.load %arg4[%c16, %c0_18] : memref<32x272xf32, #tpu.memory_space<vmem>>, vector<8x272xf32>
    %c0_19 = arith.constant 0 : index
    %c0_20 = arith.constant 0 : index
    %c1_21 = arith.constant 1 : index
    %17 = vector.load %arg5[%c0_19, %c0_20, %c1_21] : memref<4x8x290xf32, #tpu.memory_space<vmem>>, vector<1x8x272xf32>
    %18 = vector.shape_cast %17 : vector<1x8x272xf32> to vector<8x272xf32>
    %19 = arith.addf %18, %16 : vector<8x272xf32>
    %c0_22 = arith.constant 0 : index
    %c0_23 = arith.constant 0 : index
    %c1_24 = arith.constant 1 : index
    %20 = vector.load %arg5[%c0_22, %c0_23, %c1_24] : memref<4x8x290xf32, #tpu.memory_space<vmem>>, vector<1x8x272xf32>
    %21 = vector.shape_cast %20 : vector<1x8x272xf32> to vector<8x272xf32>
    %22 = vector.shape_cast %19 : vector<8x272xf32> to vector<1x8x272xf32>
    tpu.vector_store %arg5[%c0_22, %c0_23, %c1_24], %22 {strides = array<i32>} : memref<4x8x290xf32, #tpu.memory_space<vmem>>, vector<1x8x272xf32>,
    %c24 = arith.constant 24 : index
    %c0_25 = arith.constant 0 : index
    %23 = vector.load %arg4[%c24, %c0_25] : memref<32x272xf32, #tpu.memory_space<vmem>>, vector<8x272xf32>
    %c1_26 = arith.constant 1 : index
    %c0_27 = arith.constant 0 : index
    %c1_28 = arith.constant 1 : index
    %24 = vector.load %arg5[%c1_26, %c0_27, %c1_28] : memref<4x8x290xf32, #tpu.memory_space<vmem>>, vector<1x8x272xf32>
    %25 = vector.shape_cast %24 : vector<1x8x272xf32> to vector<8x272xf32>
    %26 = arith.addf %25, %23 : vector<8x272xf32>
    %c1_29 = arith.constant 1 : index
    %c0_30 = arith.constant 0 : index
    %c1_31 = arith.constant 1 : index
    %27 = vector.load %arg5[%c1_29, %c0_30, %c1_31] : memref<4x8x290xf32, #tpu.memory_space<vmem>>, vector<1x8x272xf32>
    %28 = vector.shape_cast %27 : vector<1x8x272xf32> to vector<8x272xf32>
    %29 = vector.shape_cast %26 : vector<8x272xf32> to vector<1x8x272xf32>
    tpu.vector_store %arg5[%c1_29, %c0_30, %c1_31], %29 {strides = array<i32>} : memref<4x8x290xf32, #tpu.memory_space<vmem>>, vector<1x8x272xf32>,
    %c1_32 = arith.constant 1 : index
    %c0_33 = arith.constant 0 : index
    %c0_34 = arith.constant 0 : index
    %30 = vector.load %arg2[%c1_32, %c0_33, %c0_34] : memref<4x32x4xbf16, #tpu.memory_space<vmem>>, vector<1x32x4xbf16>
    %31 = vector.shape_cast %30 : vector<1x32x4xbf16> to vector<32x4xbf16>
    %c0_35 = arith.constant 0 : index
    %c0_36 = arith.constant 0 : index
    %c0_37 = arith.constant 0 : index
    %32 = vector.load %arg1[%c0_35, %c0_36, %c0_37] : memref<1x4x272xbf16, #tpu.memory_space<vmem>>, vector<1x4x272xbf16>
    %33 = vector.shape_cast %32 : vector<1x4x272xbf16> to vector<4x272xbf16>
    %cst_38 = arith.constant dense<0.000000e+00> : vector<32x272xf32>
    %34 = tpu.matmul %31, %33, %cst_38 {dimension_numbers = #tpu.dot_dimension_numbers<[1], [0], [0], [1], [0, 0, 1, 1], [], []>} : vector<32x4xbf16>, vector<4x272xbf16>, vector<32x272xf32> -> vector<32x272xf32>
    %c0_39 = arith.constant 0 : index
    %c0_40 = arith.constant 0 : index
    %35 = vector.load %arg4[%c0_39, %c0_40] : memref<32x272xf32, #tpu.memory_space<vmem>>, vector<32x272xf32>
    tpu.vector_store %arg4[%c0_39, %c0_40], %34 {strides = array<i32>} : memref<32x272xf32, #tpu.memory_space<vmem>>, vector<32x272xf32>,
    %c0_41 = arith.constant 0 : index
    %c0_42 = arith.constant 0 : index
    %36 = vector.load %arg4[%c0_41, %c0_42] : memref<32x272xf32, #tpu.memory_space<vmem>>, vector<8x272xf32>
    %c2 = arith.constant 2 : index
    %c0_43 = arith.constant 0 : index
    %c0_44 = arith.constant 0 : index
    %37 = vector.load %arg5[%c2, %c0_43, %c0_44] : memref<4x8x290xf32, #tpu.memory_space<vmem>>, vector<1x8x272xf32>
    %38 = vector.shape_cast %37 : vector<1x8x272xf32> to vector<8x272xf32>
    %39 = vector.shape_cast %36 : vector<8x272xf32> to vector<1x8x272xf32>
    tpu.vector_store %arg5[%c2, %c0_43, %c0_44], %39 {strides = array<i32>} : memref<4x8x290xf32, #tpu.memory_space<vmem>>, vector<1x8x272xf32>,
    %c8_45 = arith.constant 8 : index
    %c0_46 = arith.constant 0 : index
    %40 = vector.load %arg4[%c8_45, %c0_46] : memref<32x272xf32, #tpu.memory_space<vmem>>, vector<8x272xf32>
    %c3 = arith.constant 3 : index
    %c0_47 = arith.constant 0 : index
    %c0_48 = arith.constant 0 : index
    %41 = vector.load %arg5[%c3, %c0_47, %c0_48] : memref<4x8x290xf32, #tpu.memory_space<vmem>>, vector<1x8x272xf32>
    %42 = vector.shape_cast %41 : vector<1x8x272xf32> to vector<8x272xf32>
    %43 = vector.shape_cast %40 : vector<8x272xf32> to vector<1x8x272xf32>
    tpu.vector_store %arg5[%c3, %c0_47, %c0_48], %43 {strides = array<i32>} : memref<4x8x290xf32, #tpu.memory_space<vmem>>, vector<1x8x272xf32>,
    %c16_49 = arith.constant 16 : index
    %c0_50 = arith.constant 0 : index
    %44 = vector.load %arg4[%c16_49, %c0_50] : memref<32x272xf32, #tpu.memory_space<vmem>>, vector<8x272xf32>
    %c2_51 = arith.constant 2 : index
    %c0_52 = arith.constant 0 : index
    %c1_53 = arith.constant 1 : index
    %45 = vector.load %arg5[%c2_51, %c0_52, %c1_53] : memref<4x8x290xf32, #tpu.memory_space<vmem>>, vector<1x8x272xf32>
    %46 = vector.shape_cast %45 : vector<1x8x272xf32> to vector<8x272xf32>
    %47 = arith.addf %46, %44 : vector<8x272xf32>
    %c2_54 = arith.constant 2 : index
    %c0_55 = arith.constant 0 : index
    %c1_56 = arith.constant 1 : index
    %48 = vector.load %arg5[%c2_54, %c0_55, %c1_56] : memref<4x8x290xf32, #tpu.memory_space<vmem>>, vector<1x8x272xf32>
    %49 = vector.shape_cast %48 : vector<1x8x272xf32> to vector<8x272xf32>
    %50 = vector.shape_cast %47 : vector<8x272xf32> to vector<1x8x272xf32>
    tpu.vector_store %arg5[%c2_54, %c0_55, %c1_56], %50 {strides = array<i32>} : memref<4x8x290xf32, #tpu.memory_space<vmem>>, vector<1x8x272xf32>,
    %c24_57 = arith.constant 24 : index
    %c0_58 = arith.constant 0 : index
    %51 = vector.load %arg4[%c24_57, %c0_58] : memref<32x272xf32, #tpu.memory_space<vmem>>, vector<8x272xf32>
    %c3_59 = arith.constant 3 : index
    %c0_60 = arith.constant 0 : index
    %c1_61 = arith.constant 1 : index
    %52 = vector.load %arg5[%c3_59, %c0_60, %c1_61] : memref<4x8x290xf32, #tpu.memory_space<vmem>>, vector<1x8x272xf32>
    %53 = vector.shape_cast %52 : vector<1x8x272xf32> to vector<8x272xf32>
    %54 = arith.addf %53, %51 : vector<8x272xf32>
    %c3_62 = arith.constant 3 : index
    %c0_63 = arith.constant 0 : index
    %c1_64 = arith.constant 1 : index
    %55 = vector.load %arg5[%c3_62, %c0_63, %c1_64] : memref<4x8x290xf32, #tpu.memory_space<vmem>>, vector<1x8x272xf32>
    %56 = vector.shape_cast %55 : vector<1x8x272xf32> to vector<8x272xf32>
    %57 = vector.shape_cast %54 : vector<8x272xf32> to vector<1x8x272xf32>
    tpu.vector_store %arg5[%c3_62, %c0_63, %c1_64], %57 {strides = array<i32>} : memref<4x8x290xf32, #tpu.memory_space<vmem>>, vector<1x8x272xf32>,
    %c2_65 = arith.constant 2 : index
    %c0_66 = arith.constant 0 : index
    %c0_67 = arith.constant 0 : index
    %58 = vector.load %arg2[%c2_65, %c0_66, %c0_67] : memref<4x32x4xbf16, #tpu.memory_space<vmem>>, vector<1x32x4xbf16>
    %59 = vector.shape_cast %58 : vector<1x32x4xbf16> to vector<32x4xbf16>
    %c0_68 = arith.constant 0 : index
    %c0_69 = arith.constant 0 : index
    %c0_70 = arith.constant 0 : index
    %60 = vector.load %arg1[%c0_68, %c0_69, %c0_70] : memref<1x4x272xbf16, #tpu.memory_space<vmem>>, vector<1x4x272xbf16>
    %61 = vector.shape_cast %60 : vector<1x4x272xbf16> to vector<4x272xbf16>
    %cst_71 = arith.constant dense<0.000000e+00> : vector<32x272xf32>
    %62 = tpu.matmul %59, %61, %cst_71 {dimension_numbers = #tpu.dot_dimension_numbers<[1], [0], [0], [1], [0, 0, 1, 1], [], []>} : vector<32x4xbf16>, vector<4x272xbf16>, vector<32x272xf32> -> vector<32x272xf32>
    %c0_72 = arith.constant 0 : index
    %c0_73 = arith.constant 0 : index
    %63 = vector.load %arg4[%c0_72, %c0_73] : memref<32x272xf32, #tpu.memory_space<vmem>>, vector<32x272xf32>
    tpu.vector_store %arg4[%c0_72, %c0_73], %62 {strides = array<i32>} : memref<32x272xf32, #tpu.memory_space<vmem>>, vector<32x272xf32>,
    %c0_74 = arith.constant 0 : index
    %c0_75 = arith.constant 0 : index
    %64 = vector.load %arg4[%c0_74, %c0_75] : memref<32x272xf32, #tpu.memory_space<vmem>>, vector<8x272xf32>
    %c0_76 = arith.constant 0 : index
    %c0_77 = arith.constant 0 : index
    %c17 = arith.constant 17 : index
    %65 = vector.load %arg5[%c0_76, %c0_77, %c17] : memref<4x8x290xf32, #tpu.memory_space<vmem>>, vector<1x8x272xf32>
    %66 = vector.shape_cast %65 : vector<1x8x272xf32> to vector<8x272xf32>
    %67 = arith.addf %66, %64 : vector<8x272xf32>
    %c0_78 = arith.constant 0 : index
    %c0_79 = arith.constant 0 : index
    %c17_80 = arith.constant 17 : index
    %68 = vector.load %arg5[%c0_78, %c0_79, %c17_80] : memref<4x8x290xf32, #tpu.memory_space<vmem>>, vector<1x8x272xf32>
    %69 = vector.shape_cast %68 : vector<1x8x272xf32> to vector<8x272xf32>
    %70 = vector.shape_cast %67 : vector<8x272xf32> to vector<1x8x272xf32>
    tpu.vector_store %arg5[%c0_78, %c0_79, %c17_80], %70 {strides = array<i32>} : memref<4x8x290xf32, #tpu.memory_space<vmem>>, vector<1x8x272xf32>,
    %c8_81 = arith.constant 8 : index
    %c0_82 = arith.constant 0 : index
    %71 = vector.load %arg4[%c8_81, %c0_82] : memref<32x272xf32, #tpu.memory_space<vmem>>, vector<8x272xf32>
    %c1_83 = arith.constant 1 : index
    %c0_84 = arith.constant 0 : index
    %c17_85 = arith.constant 17 : index
    %72 = vector.load %arg5[%c1_83, %c0_84, %c17_85] : memref<4x8x290xf32, #tpu.memory_space<vmem>>, vector<1x8x272xf32>
    %73 = vector.shape_cast %72 : vector<1x8x272xf32> to vector<8x272xf32>
    %74 = arith.addf %73, %71 : vector<8x272xf32>
    %c1_86 = arith.constant 1 : index
    %c0_87 = arith.constant 0 : index
    %c17_88 = arith.constant 17 : index
    %75 = vector.load %arg5[%c1_86, %c0_87, %c17_88] : memref<4x8x290xf32, #tpu.memory_space<vmem>>, vector<1x8x272xf32>
    %76 = vector.shape_cast %75 : vector<1x8x272xf32> to vector<8x272xf32>
    %77 = vector.shape_cast %74 : vector<8x272xf32> to vector<1x8x272xf32>
    tpu.vector_store %arg5[%c1_86, %c0_87, %c17_88], %77 {strides = array<i32>} : memref<4x8x290xf32, #tpu.memory_space<vmem>>, vector<1x8x272xf32>,
    %c16_89 = arith.constant 16 : index
    %c0_90 = arith.constant 0 : index
    %78 = vector.load %arg4[%c16_89, %c0_90] : memref<32x272xf32, #tpu.memory_space<vmem>>, vector<8x272xf32>
    %c0_91 = arith.constant 0 : index
    %c0_92 = arith.constant 0 : index
    %c18 = arith.constant 18 : index
    %79 = vector.load %arg5[%c0_91, %c0_92, %c18] : memref<4x8x290xf32, #tpu.memory_space<vmem>>, vector<1x8x272xf32>
    %80 = vector.shape_cast %79 : vector<1x8x272xf32> to vector<8x272xf32>
    %81 = arith.addf %80, %78 : vector<8x272xf32>
    %c0_93 = arith.constant 0 : index
    %c0_94 = arith.constant 0 : index
    %c18_95 = arith.constant 18 : index
    %82 = vector.load %arg5[%c0_93, %c0_94, %c18_95] : memref<4x8x290xf32, #tpu.memory_space<vmem>>, vector<1x8x272xf32>
    %83 = vector.shape_cast %82 : vector<1x8x272xf32> to vector<8x272xf32>
    %84 = vector.shape_cast %81 : vector<8x272xf32> to vector<1x8x272xf32>
    tpu.vector_store %arg5[%c0_93, %c0_94, %c18_95], %84 {strides = array<i32>} : memref<4x8x290xf32, #tpu.memory_space<vmem>>, vector<1x8x272xf32>,
    %c24_96 = arith.constant 24 : index
    %c0_97 = arith.constant 0 : index
    %85 = vector.load %arg4[%c24_96, %c0_97] : memref<32x272xf32, #tpu.memory_space<vmem>>, vector<8x272xf32>
    %c1_98 = arith.constant 1 : index
    %c0_99 = arith.constant 0 : index
    %c18_100 = arith.constant 18 : index
    %86 = vector.load %arg5[%c1_98, %c0_99, %c18_100] : memref<4x8x290xf32, #tpu.memory_space<vmem>>, vector<1x8x272xf32>
    %87 = vector.shape_cast %86 : vector<1x8x272xf32> to vector<8x272xf32>
    %88 = arith.addf %87, %85 : vector<8x272xf32>
    %c1_101 = arith.constant 1 : index
    %c0_102 = arith.constant 0 : index
    %c18_103 = arith.constant 18 : index
    %89 = vector.load %arg5[%c1_101, %c0_102, %c18_103] : memref<4x8x290xf32, #tpu.memory_space<vmem>>, vector<1x8x272xf32>
    %90 = vector.shape_cast %89 : vector<1x8x272xf32> to vector<8x272xf32>
    %91 = vector.shape_cast %88 : vector<8x272xf32> to vector<1x8x272xf32>
    tpu.vector_store %arg5[%c1_101, %c0_102, %c18_103], %91 {strides = array<i32>} : memref<4x8x290xf32, #tpu.memory_space<vmem>>, vector<1x8x272xf32>,
    %c3_104 = arith.constant 3 : index
    %c0_105 = arith.constant 0 : index
    %c0_106 = arith.constant 0 : index
    %92 = vector.load %arg2[%c3_104, %c0_105, %c0_106] : memref<4x32x4xbf16, #tpu.memory_space<vmem>>, vector<1x32x4xbf16>
    %93 = vector.shape_cast %92 : vector<1x32x4xbf16> to vector<32x4xbf16>
    %c0_107 = arith.constant 0 : index
    %c0_108 = arith.constant 0 : index
    %c0_109 = arith.constant 0 : index
    %94 = vector.load %arg1[%c0_107, %c0_108, %c0_109] : memref<1x4x272xbf16, #tpu.memory_space<vmem>>, vector<1x4x272xbf16>
    %95 = vector.shape_cast %94 : vector<1x4x272xbf16> to vector<4x272xbf16>
    %cst_110 = arith.constant dense<0.000000e+00> : vector<32x272xf32>
    %96 = tpu.matmul %93, %95, %cst_110 {dimension_numbers = #tpu.dot_dimension_numbers<[1], [0], [0], [1], [0, 0, 1, 1], [], []>} : vector<32x4xbf16>, vector<4x272xbf16>, vector<32x272xf32> -> vector<32x272xf32>
    %c0_111 = arith.constant 0 : index
    %c0_112 = arith.constant 0 : index
    %97 = vector.load %arg4[%c0_111, %c0_112] : memref<32x272xf32, #tpu.memory_space<vmem>>, vector<32x272xf32>
    tpu.vector_store %arg4[%c0_111, %c0_112], %96 {strides = array<i32>} : memref<32x272xf32, #tpu.memory_space<vmem>>, vector<32x272xf32>,
    %c0_113 = arith.constant 0 : index
    %c0_114 = arith.constant 0 : index
    %98 = vector.load %arg4[%c0_113, %c0_114] : memref<32x272xf32, #tpu.memory_space<vmem>>, vector<8x272xf32>
    %c2_115 = arith.constant 2 : index
    %c0_116 = arith.constant 0 : index
    %c17_117 = arith.constant 17 : index
    %99 = vector.load %arg5[%c2_115, %c0_116, %c17_117] : memref<4x8x290xf32, #tpu.memory_space<vmem>>, vector<1x8x272xf32>
    %100 = vector.shape_cast %99 : vector<1x8x272xf32> to vector<8x272xf32>
    %101 = arith.addf %100, %98 : vector<8x272xf32>
    %c2_118 = arith.constant 2 : index
    %c0_119 = arith.constant 0 : index
    %c17_120 = arith.constant 17 : index
    %102 = vector.load %arg5[%c2_118, %c0_119, %c17_120] : memref<4x8x290xf32, #tpu.memory_space<vmem>>, vector<1x8x272xf32>
    %103 = vector.shape_cast %102 : vector<1x8x272xf32> to vector<8x272xf32>
    %104 = vector.shape_cast %101 : vector<8x272xf32> to vector<1x8x272xf32>
    tpu.vector_store %arg5[%c2_118, %c0_119, %c17_120], %104 {strides = array<i32>} : memref<4x8x290xf32, #tpu.memory_space<vmem>>, vector<1x8x272xf32>,
    %c8_121 = arith.constant 8 : index
    %c0_122 = arith.constant 0 : index
    %105 = vector.load %arg4[%c8_121, %c0_122] : memref<32x272xf32, #tpu.memory_space<vmem>>, vector<8x272xf32>
    %c3_123 = arith.constant 3 : index
    %c0_124 = arith.constant 0 : index
    %c17_125 = arith.constant 17 : index
    %106 = vector.load %arg5[%c3_123, %c0_124, %c17_125] : memref<4x8x290xf32, #tpu.memory_space<vmem>>, vector<1x8x272xf32>
    %107 = vector.shape_cast %106 : vector<1x8x272xf32> to vector<8x272xf32>
    %108 = arith.addf %107, %105 : vector<8x272xf32>
    %c3_126 = arith.constant 3 : index
    %c0_127 = arith.constant 0 : index
    %c17_128 = arith.constant 17 : index
    %109 = vector.load %arg5[%c3_126, %c0_127, %c17_128] : memref<4x8x290xf32, #tpu.memory_space<vmem>>, vector<1x8x272xf32>
    %110 = vector.shape_cast %109 : vector<1x8x272xf32> to vector<8x272xf32>
    %111 = vector.shape_cast %108 : vector<8x272xf32> to vector<1x8x272xf32>
    tpu.vector_store %arg5[%c3_126, %c0_127, %c17_128], %111 {strides = array<i32>} : memref<4x8x290xf32, #tpu.memory_space<vmem>>, vector<1x8x272xf32>,
    %c16_129 = arith.constant 16 : index
    %c0_130 = arith.constant 0 : index
    %112 = vector.load %arg4[%c16_129, %c0_130] : memref<32x272xf32, #tpu.memory_space<vmem>>, vector<8x272xf32>
    %c2_131 = arith.constant 2 : index
    %c0_132 = arith.constant 0 : index
    %c18_133 = arith.constant 18 : index
    %113 = vector.load %arg5[%c2_131, %c0_132, %c18_133] : memref<4x8x290xf32, #tpu.memory_space<vmem>>, vector<1x8x272xf32>
    %114 = vector.shape_cast %113 : vector<1x8x272xf32> to vector<8x272xf32>
    %115 = arith.addf %114, %112 : vector<8x272xf32>
    %c2_134 = arith.constant 2 : index
    %c0_135 = arith.constant 0 : index
    %c18_136 = arith.constant 18 : index
    %116 = vector.load %arg5[%c2_134, %c0_135, %c18_136] : memref<4x8x290xf32, #tpu.memory_space<vmem>>, vector<1x8x272xf32>
    %117 = vector.shape_cast %116 : vector<1x8x272xf32> to vector<8x272xf32>
    %118 = vector.shape_cast %115 : vector<8x272xf32> to vector<1x8x272xf32>
    tpu.vector_store %arg5[%c2_134, %c0_135, %c18_136], %118 {strides = array<i32>} : memref<4x8x290xf32, #tpu.memory_space<vmem>>, vector<1x8x272xf32>,
    %c24_137 = arith.constant 24 : index
    %c0_138 = arith.constant 0 : index
    %119 = vector.load %arg4[%c24_137, %c0_138] : memref<32x272xf32, #tpu.memory_space<vmem>>, vector<8x272xf32>
    %c3_139 = arith.constant 3 : index
    %c0_140 = arith.constant 0 : index
    %c18_141 = arith.constant 18 : index
    %120 = vector.load %arg5[%c3_139, %c0_140, %c18_141] : memref<4x8x290xf32, #tpu.memory_space<vmem>>, vector<1x8x272xf32>
    %121 = vector.shape_cast %120 : vector<1x8x272xf32> to vector<8x272xf32>
    %122 = arith.addf %121, %119 : vector<8x272xf32>
    %c3_142 = arith.constant 3 : index
    %c0_143 = arith.constant 0 : index
    %c18_144 = arith.constant 18 : index
    %123 = vector.load %arg5[%c3_142, %c0_143, %c18_144] : memref<4x8x290xf32, #tpu.memory_space<vmem>>, vector<1x8x272xf32>
    %124 = vector.shape_cast %123 : vector<1x8x272xf32> to vector<8x272xf32>
    %125 = vector.shape_cast %122 : vector<8x272xf32> to vector<1x8x272xf32>
    tpu.vector_store %arg5[%c3_142, %c0_143, %c18_144], %125 {strides = array<i32>} : memref<4x8x290xf32, #tpu.memory_space<vmem>>, vector<1x8x272xf32>,
    %c0_145 = arith.constant 0 : index
    %c0_146 = arith.constant 0 : index
    %c0_147 = arith.constant 0 : index
    %126 = vector.load %arg5[%c0_145, %c0_146, %c0_147] : memref<4x8x290xf32, #tpu.memory_space<vmem>>, vector<1x8x289xf32>
    %127 = vector.shape_cast %126 : vector<1x8x289xf32> to vector<8x289xf32>
    %c0_148 = arith.constant 0 : index
    %c0_149 = arith.constant 0 : index
    %c0_150 = arith.constant 0 : index
    %c0_151 = arith.constant 0 : index
    %128 = vector.load %arg3[%c0_148, %c0_149, %c0_150, %c0_151] : memref<1x4x8x289xf32, #tpu.memory_space<vmem>>, vector<1x1x8x289xf32>
    %129 = vector.shape_cast %128 : vector<1x1x8x289xf32> to vector<8x289xf32>
    %130 = vector.shape_cast %127 : vector<8x289xf32> to vector<1x1x8x289xf32>
    tpu.vector_store %arg3[%c0_148, %c0_149, %c0_150, %c0_151], %130 {strides = array<i32>} : memref<1x4x8x289xf32, #tpu.memory_space<vmem>>, vector<1x1x8x289xf32>,
    %c1_152 = arith.constant 1 : index
    %c0_153 = arith.constant 0 : index
    %c0_154 = arith.constant 0 : index
    %131 = vector.load %arg5[%c1_152, %c0_153, %c0_154] : memref<4x8x290xf32, #tpu.memory_space<vmem>>, vector<1x8x289xf32>
    %132 = vector.shape_cast %131 : vector<1x8x289xf32> to vector<8x289xf32>
    %c0_155 = arith.constant 0 : index
    %c1_156 = arith.constant 1 : index
    %c0_157 = arith.constant 0 : index
    %c0_158 = arith.constant 0 : index
    %133 = vector.load %arg3[%c0_155, %c1_156, %c0_157, %c0_158] : memref<1x4x8x289xf32, #tpu.memory_space<vmem>>, vector<1x1x8x289xf32>
    %134 = vector.shape_cast %133 : vector<1x1x8x289xf32> to vector<8x289xf32>
    %135 = vector.shape_cast %132 : vector<8x289xf32> to vector<1x1x8x289xf32>
    tpu.vector_store %arg3[%c0_155, %c1_156, %c0_157, %c0_158], %135 {strides = array<i32>} : memref<1x4x8x289xf32, #tpu.memory_space<vmem>>, vector<1x1x8x289xf32>,
    %c2_159 = arith.constant 2 : index
    %c0_160 = arith.constant 0 : index
    %c0_161 = arith.constant 0 : index
    %136 = vector.load %arg5[%c2_159, %c0_160, %c0_161] : memref<4x8x290xf32, #tpu.memory_space<vmem>>, vector<1x8x289xf32>
    %137 = vector.shape_cast %136 : vector<1x8x289xf32> to vector<8x289xf32>
    %c0_162 = arith.constant 0 : index
    %c2_163 = arith.constant 2 : index
    %c0_164 = arith.constant 0 : index
    %c0_165 = arith.constant 0 : index
    %138 = vector.load %arg3[%c0_162, %c2_163, %c0_164, %c0_165] : memref<1x4x8x289xf32, #tpu.memory_space<vmem>>, vector<1x1x8x289xf32>
    %139 = vector.shape_cast %138 : vector<1x1x8x289xf32> to vector<8x289xf32>
    %140 = vector.shape_cast %137 : vector<8x289xf32> to vector<1x1x8x289xf32>
    tpu.vector_store %arg3[%c0_162, %c2_163, %c0_164, %c0_165], %140 {strides = array<i32>} : memref<1x4x8x289xf32, #tpu.memory_space<vmem>>, vector<1x1x8x289xf32>,
    %c3_166 = arith.constant 3 : index
    %c0_167 = arith.constant 0 : index
    %c0_168 = arith.constant 0 : index
    %141 = vector.load %arg5[%c3_166, %c0_167, %c0_168] : memref<4x8x290xf32, #tpu.memory_space<vmem>>, vector<1x8x289xf32>
    %142 = vector.shape_cast %141 : vector<1x8x289xf32> to vector<8x289xf32>
    %c0_169 = arith.constant 0 : index
    %c3_170 = arith.constant 3 : index
    %c0_171 = arith.constant 0 : index
    %c0_172 = arith.constant 0 : index
    %143 = vector.load %arg3[%c0_169, %c3_170, %c0_171, %c0_172] : memref<1x4x8x289xf32, #tpu.memory_space<vmem>>, vector<1x1x8x289xf32>
    %144 = vector.shape_cast %143 : vector<1x1x8x289xf32> to vector<8x289xf32>
    %145 = vector.shape_cast %142 : vector<8x289xf32> to vector<1x1x8x289xf32>
    tpu.vector_store %arg3[%c0_169, %c3_170, %c0_171, %c0_172], %145 {strides = array<i32>} : memref<1x4x8x289xf32, #tpu.memory_space<vmem>>, vector<1x1x8x289xf32>,
    return
  }
  func.func @transform_0(%arg0: i32) -> (i32, i32, i32) {
    %c0_i32 = arith.constant 0 : i32
    %c0_i32_0 = arith.constant 0 : i32
    %c0_i32_1 = arith.constant 0 : i32
    return %arg0, %c0_i32, %c0_i32_0 : i32, i32, i32
  }
  func.func @transform_1(%arg0: i32) -> (i32, i32, i32) {
    %c0_i32 = arith.constant 0 : i32
    %c0_i32_0 = arith.constant 0 : i32
    %c0_i32_1 = arith.constant 0 : i32
    %c0_i32_2 = arith.constant 0 : i32
    return %c0_i32, %c0_i32_0, %c0_i32_1 : i32, i32, i32
  }
  func.func @transform_2(%arg0: i32) -> (i32, i32, i32, i32) {
    %c0_i32 = arith.constant 0 : i32
    %c0_i32_0 = arith.constant 0 : i32
    %c0_i32_1 = arith.constant 0 : i32
    %c0_i32_2 = arith.constant 0 : i32
    return %arg0, %c0_i32, %c0_i32_0, %c0_i32_1 : i32, i32, i32, i32
  }
}

</mosaic_0001>

<bundles_post_ra>
// kernel: tpu_custom_call.1
= control target key start
LH: loop header
LB: loop body
LE: loop exit
PB: predicated region body
PF: predicated region fallthrough
CT: control target
= control target key end

     0   :  { %7 = vsyncpa [#allocation5], 0  ;;  %s1841_s0 = inlined_call_operand.vmem [shape: bf16[2,4,272], index: 0, kind: input, shape index: {}]   ;;  %s1842_s1 = inlined_call_operand.vmem [shape: bf16[4,32,4], index: 1, kind: input, shape index: {}]   ;;  %s1843_s2 = inlined_call_operand.hbm [shape: f32[2,4,8,289], index: 2, kind: output, shape index: {}]  }
   0x1   :  { %9 = vsyncpa [#allocation5 + $0x1], 0  ;;  %s1495_s9 = smov 0   ;;  %s1497_s10 = smov 0  }
   0x2   :  { %s1499_s11 = smov 0   ;;  %s1501_s12 = smov 0  }
   0x3 LB: > { %s1516_s13 = sadd.s32 4294967295, %s1469_s12   ;;  %s1248_s14 = sadd.s32 4294967294, %s1469_s12   ;;  %s1469_s12 = sphi %s1501_s12, %s1849_s12   ;;  %s1465_s11 = sphi %s1499_s11, %s1848_s11   ;;  %s1461_s10 = sphi %s1497_s10, %s1847_s10   ;;  %s1457_s9 = sphi %s1495_s9, %s1846_s9  }
   0x4   : > { %s1520_s15 = sadd.s32 1, %s1469_s12   ;;  %s69_s16 = sadd.s32 1, %s1465_s11 }
   0x5   : > { %s66_s17 = ssub.s32 %s1469_s12, %s1520_s15  ;;  %p79_p0 = scmp.ne.s32.totalorder %s1465_s11, %s1461_s10 }
   0x6   : > { %p67_p1 = scmp.eq.s32.totalorder %s66_s17, 0  ;;  %p80_p2 = scmp.eq.s32.totalorder %s1516_s13, 1 }
   0x7   : > { %p85_p3 = scmp.ne.s32.totalorder %s1461_s10, %s1457_s9  ;;  %p86_p4 = scmp.eq.s32.totalorder %s1248_s14, 1 }
   0x8   : > { %s1531_s18 = scalar_select %p67_p1, %s1465_s11, %s69_s16  }
   0x9   : > { %p1533_p5 = por %p80_p2, %p79_p0  ;;  %p1537_p6 = por %p86_p4, %p85_p3 }
   0xa   : > { %p1251_p7 = scmp.ge.s32.totalorder %s1469_s12, 1  ;;  %p115_p8 = scmp.lt.s32.totalorder %s1469_s12, 3 }
   0xc   : > { %p116_p9 = pnand %p1251_p7, %p115_p8 }
   0xd   : > { %p137_p10 = scmp.lt.s32.totalorder (!%p116_p9), %s1516_s13, 1  ;;  %v168_v0 = vlaneseq (!%p116_p9)  ;;  %v1396_v1 = vld [vmem:[%s1842_s1] sm:$0xff] (!%p116_p9)   ;;  %v1471_v2 = vmov (!%p116_p9), 1983009808   ;;  %v1472_v4 = vmov (!%p116_p9), 0   ;;  %vm180_vm0 = vcmask (!%p116_p9), 31744  }
   0xe   : > { %119 = sbr.rel (%p116_p9) target bundleno = 464 (0x1d0), region = 28  ;;  %v166_v3 = vunpack.c.l.s4 (!%p116_p9), %v1471_v2  ;;  %229 = vmatprep.mubr.bf16.mxu0 (!%p116_p9), %v1472_v4  ;;  %1319 = vmatprep.mubr.msk.bf16.mxu1 (!%p116_p9), %vm180_vm0, %v1396_v1  ;;  %vm187_vm1 = vcmask (!%p116_p9), 1041408   ;;  %v1397_v23 = vld [vmem:[%s1842_s1 + $0x8] sm:$0xff] (!%p116_p9)   ;;  %v1399_v30 = vld [vmem:[%s1842_s1 + $0x10] sm:$0xff] (!%p116_p9)   ;;  %v1400_v34 = vld [vmem:[%s1842_s1 + $0x18] sm:$0xff] (!%p116_p9)   ;;  %vm143_vm2 = vcmask (!%p116_p9), 277632  }
   0xf   : > { %v169_v5 = vshrl.u32 (!%p116_p9), %v168_v0, 7  ;;  %v1402_v36 = vld [vmem:[%s1842_s1 + $0x20] sm:$0xff] (!%p116_p9)   ;;  %v1403_v38 = vld [vmem:[%s1842_s1 + $0x28] sm:$0xff] (!%p116_p9)   ;;  %v1404_v41 = vld [vmem:[%s1842_s1 + $0x30] sm:$0xff] (!%p116_p9)   ;;  %v1473_v43 = vmov (!%p116_p9), 0.0   ;;  %vm301_vm3 = vcmask (!%p116_p9), 130048  }
  0x10   : > { %v167_v6 = vunpack.c.0.s8 (!%p116_p9), %v166_v3  ;;  %v1406_v42 = vld [vmem:[%s1842_s1 + $0x38] sm:$0xff] (!%p116_p9)   ;;  %144 = vst.msk [vmem:[#allocation3 + $0x10] sm:$0xff] (!%p116_p9), %vm143_vm2, %v1473_v43  ;;  %145 = vst.msk [vmem:[#allocation3 + $0x28] sm:$0xff] (!%p116_p9), %vm143_vm2, %v1473_v43  ;;  %s1476_s25 = smov (!%p116_p9), 18   ;;  %vm349_vm4 = vcmask (!%p116_p9), 1047560   ;;  %vm340_vm5 = vcmask (!%p116_p9), 7168  }
  0x11   : > { %146 = vst.msk [vmem:[#allocation3 + $0x40] sm:$0xff] (!%p116_p9), %vm143_vm2, %v1473_v43  ;;  %147 = vst.msk [vmem:[#allocation3 + $0x58] sm:$0xff] (!%p116_p9), %vm143_vm2, %v1473_v43  ;;  %vm352_vm6 = vcmask (!%p116_p9), 138240   ;;  %vm793_vm7 = vcmask (!%p116_p9), 1047688   ;;  %vm796_vm8 = vcmask (!%p116_p9), 269312   ;;  %s134_s26 = sand.u32 (!%p116_p9), 1, %s1461_s10  }
  0x12   : > { %v170_v7 = vsub.s32 (!%p116_p9), %v167_v6, %v169_v5  ;;  %vm839_vm9 = vcmask (!%p116_p9), 146432   ;;  %vm848_vm10 = vcmask (!%p116_p9), 1047696   ;;  %vm851_vm11 = vcmask (!%p116_p9), 277504   ;;  %s1347_s29 = smul.u32 (!%p116_p9), 1536, %s1516_s13  ;;  %s1477_s7 = smov (!%p116_p9), [#allocation4]  }
  0x13   : > { %s1411_s8 = sshll.u32 (!%p116_p9), %s1477_s7, 4  ;;  %s1412_s8 = int_to_ptr.vmem [resolvable:$false] %s1411_s8 }
  0x14   : > { %s1790_s5 = scalar_lea.hbm (!%p116_p9), %s1843_s2, %s1347_s29  ;;  %s1413_s14 = scalar_lea.vmem (!%p116_p9), %s1412_s8, 3072 }
  0x15   : > { %s138_s23 = scalar_select %p137_p10, %s1516_s13, 1 }
  0x16   : > { %s1800_s13 = scalar_lea.sflag [#allocation5], %s134_s26 }
  0x17   : > { %s1346_s24 = smul.u32 6, %s138_s23  ;;  %s1474_s23 = smov 1  }
  0x19   : > { %s141_s27 = scalar_lea.vmem %s1841_s0, %s1346_s24  ;;  %s1475_s24 = smov 17  }
  0x1a   : > { %v152_v8 = vld [vmem:[%s141_s27] sm:$0x3f] }
  0x1b   : > { %v385_v9 = vld [vmem:[%s141_s27] sm:$0x3f]  ;;  %v171_v10 = vrot.slane %v152_v8, %v170_v7  ;;  %v164_v11 = vcombine.high %v152_v8, %v152_v8 }
  0x1c   : > { %v404_v12 = vrot.slane %v385_v9, %v170_v7  ;;  %v397_v13 = vcombine.high %v385_v9, %v385_v9  ;;  %v613_v14 = vld [vmem:[%s141_s27] sm:$0x3f] }
  0x1d   : > { %v179_v15 = vcombine.high %v171_v10, %v171_v10  ;;  %v178_v16 = vrot.slane %v164_v11, %v170_v7  ;;  %v189_v17 = vsel %vm187_vm1, %v171_v10, 0  ;;  %v625_v20 = vcombine.high %v613_v14, %v613_v14  ;;  %v884_v28 = vld [vmem:[%s141_s27] sm:$0x3f]  ;;  %s1345_s27 = smul.u32 96, %s134_s26 }
  0x1e   : > { %v412_v18 = vcombine.high %v404_v12, %v404_v12  ;;  %v411_v19 = vrot.slane %v397_v13, %v170_v7  ;;  %v632_v21 = vrot.slane %v613_v14, %v170_v7  ;;  %v420_v24 = vsel %vm187_vm1, %v404_v12, 0 }
  0x1f   : > { %1255 = vmatprep.subr.msk.bf16.mxu0 %vm187_vm1, %v179_v15  ;;  %1341 = vmatprep.subr.msk.bf16.mxu1 %vm187_vm1, %v178_v16  ;;  %v195_v22 = vsel %vm187_vm1, %v178_v16, 0  ;;  %v639_v26 = vrot.slane %v625_v20, %v170_v7  ;;  %v903_v29 = vrot.slane %v884_v28, %v170_v7  ;;  %v896_v33 = vcombine.high %v884_v28, %v884_v28  ;;  %s1742_s28 = scalar_lea.vmem [#allocation4], %s1345_s27 }
  0x20   : > { %198 = vmatpush1.bf16.msra.mxu0 %v189_v17  ;;  %1318 = vmatpush3.bf16.msra.mxu1 %v195_v22  ;;  %v426_v25 = vsel %vm187_vm1, %v411_v19, 0  ;;  %v640_v27 = vcombine.high %v632_v21, %v632_v21  ;;  %v648_v35 = vsel %vm187_vm1, %v632_v21, 0  ;;  %s1186_s30 = sshll.u32 %s1742_s28, 4  ;;  %s1792_s30 = int_to_ptr.vmem [resolvable:$true] %s1186_s30 }
  0x21   : > { %1266 = vmatprep.subr.msk.bf16.mxu1 %vm187_vm1, %v412_v18  ;;  %1342 = vmatprep.subr.msk.bf16.mxu0 %vm187_vm1, %v411_v19  ;;  %v654_v31 = vsel %vm187_vm1, %v639_v26, 0  ;;  %v911_v32 = vcombine.high %v903_v29, %v903_v29  ;;  %v910_v37 = vrot.slane %v896_v33, %v170_v7  ;;  %v919_v39 = vsel %vm187_vm1, %v903_v29, 0  ;;  %s1407_s6 = scalar_lea.vmem %s1792_s30, 1536  ;;  %p1414_p0 = scmp.lt.s32.totalorder %s1792_s30, %s1412_s8 }
  0x22   : > { %p1408_p11 = scmp.ne.s32.totalorder %s1792_s30, %s1407_s6  ;;  %p1415_p1 = scmp.lt.s32.totalorder %s1413_s14, %s1407_s6 }
  0x23   : > { %1256 = vmatmul.mubr.msk.bf16.vlgmr.msra.gmra.mrb[0].mxu0 %vm180_vm0, %v1396_v1  ;;  %1320 = vmatmul.mubr.msk.bf16.vlgmr.msra.gmra.mrb[0].mxu1 %vm180_vm0, %v1397_v23  ;;  %v925_v40 = vsel %vm187_vm1, %v910_v37, 0 }
  0x24   : > { %429 = vmatpush1.bf16.msra.mxu1 %v420_v24  ;;  %239 = vmatprep.mubr.bf16.mxu0 %v1472_v4  ;;  %p1409_p12 = pnand %p1408_p11, %p1533_p5  ;;  %p1416_p2 = por %p1415_p1, %p1414_p0 }
  0x25   : > { %460 = vmatprep.mubr.bf16.mxu1 %v1472_v4  ;;  %1324 = vmatpush3.bf16.msra.mxu0 %v426_v25 }
  0x26   : > { %1343 = vmatprep.subr.msk.bf16.mxu1 %vm187_vm1, %v639_v26  ;;  %1277 = vmatprep.subr.msk.bf16.mxu0 %vm187_vm1, %v640_v27  ;;  %p1410_p13 = pneg %p1409_p12 }
  0x28   : > { %p1417_p3 = pnand %p1416_p2, %p1410_p13 }
  0x2b   : > { %1257 = vmatmul.mubr.msk.bf16.gmra.mrb[4].mxu0 %vm180_vm0, %v1397_v23  ;;  %1267 = vmatmul.mubr.msk.bf16.vlgmr.msra.gmra.mrb[4].mxu1 %vm180_vm0, %v1399_v30 }
  0x2c   : > { %470 = vmatprep.mubr.bf16.mxu1 %v1472_v4  ;;  %1325 = vmatprep.mubr.msk.bf16.mxu0 %vm180_vm0, %v1399_v30 }
  0x2d   : > { %1330 = vmatpush3.bf16.msra.mxu1 %v654_v31 }
  0x2e   : > { %1288 = vmatprep.subr.msk.bf16.mxu1 %vm187_vm1, %v911_v32 }
  0x33   : > { %1268 = vmatmul.mubr.msk.bf16.gmra.mrb[8].mxu1 %vm180_vm0, %v1400_v34  ;;  %1326 = vmatmul.mubr.msk.bf16.vlgmr.msra.gmra.mrb[8].mxu0 %vm180_vm0, %v1400_v34 }
  0x34   : > { %657 = vmatpush1.bf16.msra.mxu0 %v648_v35  ;;  %688 = vmatprep.mubr.bf16.mxu0 %v1472_v4 }
  0x35   : > { %1331 = vmatprep.mubr.msk.bf16.mxu1 %vm180_vm0, %v1402_v36  ;;  %1344 = vmatprep.subr.msk.bf16.mxu0 %vm187_vm1, %v910_v37 }
  0x3b   : > { %1278 = vmatmul.mubr.msk.bf16.vlgmr.msra.gmra.mrb[12].mxu0 %vm180_vm0, %v1402_v36  ;;  %1332 = vmatmul.mubr.msk.bf16.vlgmr.msra.gmra.mrb[12].mxu1 %vm180_vm0, %v1403_v38 }
  0x3c   : > { %928 = vmatpush1.bf16.msra.mxu1 %v919_v39  ;;  %959 = vmatprep.mubr.bf16.mxu1 %v1472_v4 }
  0x3d   : > { %1336 = vmatpush3.bf16.msra.mxu0 %v925_v40  ;;  %698 = vmatprep.mubr.bf16.mxu0 %v1472_v4 }
  0x43   : > { %1289 = vmatmul.mubr.msk.bf16.vlgmr.msra.gmra.mrb[16].mxu1 %vm180_vm0, %v1404_v41  ;;  %1279 = vmatmul.mubr.msk.bf16.gmra.mrb[16].mxu0 %vm180_vm0, %v1403_v38 }
  0x44   : > { %1337 = vmatprep.mubr.msk.bf16.mxu0 %vm180_vm0, %v1404_v41  ;;  %969 = vmatprep.mubr.bf16.mxu1 %v1472_v4 }
  0x4b   : > { %1338 = vmatmul.mubr.msk.bf16.vlgmr.msra.gmra.mrb[20].mxu0 %vm180_vm0, %v1406_v42  ;;  %1290 = vmatmul.mubr.msk.bf16.gmra.mrb[20].mxu1 %vm180_vm0, %v1406_v42 }
  0xf6   : > { %v1612_v44 = vpop.f32.mrb[0].mxu0  ;;  %v1321_v45 = vpop.f32.mrb[0].mxu1 }
  0xf7   : > { %308 = vst.msk [vmem:[#allocation2 + $0x40] sm:$0xff] %vm301_vm3, %v1321_v45  ;;  %v1615_v46 = vpop.f32.mrb[1].mxu0  ;;  %v284_v47 = vpop.f32.mrb[1].mxu1  ;;  %315 = vst [vmem:[#allocation3] sm:$0xff] %v1612_v44 }
  0xf8   : > { %302 = vst.msk [vmem:[#allocation2 + $0x10] sm:$0xff] %vm301_vm3, %v284_v47  ;;  %v1619_v48 = vpop.f32.mrb[2].mxu0  ;;  %v1322_v49 = vpop.f32.mrb[2].mxu1 }
  0xf9   : > { %311 = vst.msk [vmem:[#allocation2 + $0x58] sm:$0xff] %vm301_vm3, %v1322_v49  ;;  %v1622_v50 = vpop.f32.mrb[3].mxu0  ;;  %v287_v51 = vpop.f32.mrb[3].mxu1  ;;  %322 = vst [vmem:[#allocation3 + $0x18] sm:$0xff] %v1619_v48 }
  0xfa   : > { %305 = vst.msk [vmem:[#allocation2 + $0x28] sm:$0xff] %vm301_vm3, %v287_v51 }
  0xfe   : > { %v241_v52 = vpop.f32.mrb[4].mxu0  ;;  %v1626_v53 = vpop.f32.mrb[4].mxu1  ;;  %v327_v54 = vld [vmem:[#allocation2 + $0x40] sm:$0xff] }
  0xff   : > { %v243_v55 = vpop.f32.mrb[5].mxu0  ;;  %338 = vrot.lane.b32.xlu1 %v327_v54, %s1474_s23  ;;  %v1629_v56 = vpop.f32.mrb[5].mxu1  ;;  %334 = vrot.lane.b32.xlu0 %v241_v52, %s1474_s23  ;;  %v314_v57 = vld [vmem:[#allocation2 + $0x10] sm:$0xff]  ;;  %546 = vst [vmem:[#allocation3 + $0x30] sm:$0xff] %v1626_v53 }
 0x100   : > { %v245_v58 = vpop.f32.mrb[6].mxu0  ;;  %v1633_v59 = vpop.f32.mrb[6].mxu1  ;;  %317 = vst.msk [vmem:[#allocation3 + $0x10] sm:$0xff] %vm301_vm3, %v314_v57  ;;  %v356_v63 = vld [vmem:[#allocation2 + $0x58] sm:$0xff] }
 0x101   : > { %v247_v60 = vpop.f32.mrb[7].mxu0  ;;  %v1636_v61 = vpop.f32.mrb[7].mxu1  ;;  %v320_v62 = vld [vmem:[#allocation2 + $0x28] sm:$0xff]  ;;  %553 = vst [vmem:[#allocation3 + $0x48] sm:$0xff] %v1633_v59 }
 0x102   : > { %324 = vst.msk [vmem:[#allocation3 + $0x28] sm:$0xff] %vm301_vm3, %v320_v62 }
 0x103   : > { %367 = vrot.lane.b32.xlu1 %v356_v63, %s1474_s23  ;;  %336 = vrot.lane.b32.xlu0 %v243_v55, %s1474_s23 }
 0x106   : > { %v472_v0 = vpop.f32.mrb[8].mxu1  ;;  %v1327_v1 = vpop.f32.mrb[8].mxu0 }
 0x107   : > { %v474_v2 = vpop.f32.mrb[9].mxu1  ;;  %363 = vrot.lane.b32.xlu1 %v245_v58, %s1474_s23  ;;  %538 = vst.msk [vmem:[#allocation2 + $0x40] sm:$0xff] %vm301_vm3, %v1327_v1  ;;  %v515_v3 = vpop.f32.mrb[9].mxu0  ;;  %365 = vrot.lane.b32.xlu0 %v247_v60, %s1474_s23  ;;  %v330_v54 = vld [vmem:[#allocation3 + $0x10] sm:$0xff] }
 0x108   : > { %v476_v4 = vpop.f32.mrb[10].mxu1  ;;  %532 = vst.msk [vmem:[#allocation2 + $0x10] sm:$0xff] %vm301_vm3, %v515_v3  ;;  %v1328_v5 = vpop.f32.mrb[10].mxu0 }
 0x109   : > { %v478_v6 = vpop.f32.mrb[11].mxu1  ;;  %541 = vst.msk [vmem:[#allocation2 + $0x58] sm:$0xff] %vm301_vm3, %v1328_v5  ;;  %v518_v7 = vpop.f32.mrb[11].mxu0 }
 0x10a   : > { %535 = vst.msk [vmem:[#allocation2 + $0x28] sm:$0xff] %vm301_vm3, %v518_v7 }
 0x10b   : > { %567 = vrot.lane.b32.xlu1 %v474_v2, %s1474_s23  ;;  %565 = vrot.lane.b32.xlu0 %v472_v0, %s1474_s23 }
 0x10e   : > { %v690_v8 = vpop.f32.mrb[12].mxu0  ;;  %v558_v9 = vld [vmem:[#allocation2 + $0x40] sm:$0xff]  ;;  %v1333_v10 = vpop.f32.mrb[12].mxu1 }
 0x10f   : > { %v692_v11 = vpop.f32.mrb[13].mxu0  ;;  %591 = vrot.lane.b32.xlu1 %v476_v4, %s1474_s23  ;;  %569 = vrot.lane.b32.xlu0 %v558_v9, %s1474_s23  ;;  %766 = vst.msk [vmem:[#allocation2 + $0x40] sm:$0xff] %vm301_vm3, %v1333_v10  ;;  %v544_v12 = vld [vmem:[#allocation2 + $0x10] sm:$0xff]  ;;  %v743_v13 = vpop.f32.mrb[13].mxu1 }
 0x110   : > { %v694_v14 = vpop.f32.mrb[14].mxu0  ;;  %v584_v15 = vld [vmem:[#allocation2 + $0x58] sm:$0xff]  ;;  %548 = vst.msk [vmem:[#allocation3 + $0x40] sm:$0xff] %vm301_vm3, %v544_v12  ;;  %760 = vst.msk [vmem:[#allocation2 + $0x10] sm:$0xff] %vm301_vm3, %v743_v13  ;;  %v1334_v16 = vpop.f32.mrb[14].mxu1 }
 0x111   : > { %v696_v17 = vpop.f32.mrb[15].mxu0  ;;  %769 = vst.msk [vmem:[#allocation2 + $0x58] sm:$0xff] %vm301_vm3, %v1334_v16  ;;  %v551_v18 = vld [vmem:[#allocation2 + $0x28] sm:$0xff]  ;;  %v746_v19 = vpop.f32.mrb[15].mxu1 }
 0x112   : > { %555 = vst.msk [vmem:[#allocation3 + $0x58] sm:$0xff] %vm301_vm3, %v551_v18  ;;  %763 = vst.msk [vmem:[#allocation2 + $0x28] sm:$0xff] %vm301_vm3, %v746_v19 }
 0x113   : > { %595 = vrot.lane.b32.xlu1 %v584_v15, %s1474_s23  ;;  %593 = vrot.lane.b32.xlu0 %v478_v6, %s1474_s23 }
 0x116   : > { %v961_v20 = vpop.f32.mrb[16].mxu1  ;;  %v700_v21 = vpop.f32.mrb[16].mxu0  ;;  %v826_v24 = vld [vmem:[#allocation2 + $0x40] sm:$0xff] }
 0x117   : > { %781 = vrot.lane.b32.xlu1 %v692_v11, %s1475_s24  ;;  %779 = vrot.lane.b32.xlu0 %v690_v8, %s1475_s24  ;;  %v963_v22 = vpop.f32.mrb[17].mxu1  ;;  %v702_v23 = vpop.f32.mrb[17].mxu0  ;;  %v772_v30 = vld [vmem:[#allocation2 + $0x10] sm:$0xff]  ;;  %v561_v6 = vld [vmem:[#allocation3 + $0x40] sm:$0xff] }
 0x118   : > { %v965_v25 = vpop.f32.mrb[18].mxu1  ;;  %v704_v26 = vpop.f32.mrb[18].mxu0  ;;  %v855_v29 = vld [vmem:[#allocation2 + $0x58] sm:$0xff] }
 0x119   : > { %v967_v27 = vpop.f32.mrb[19].mxu1  ;;  %v706_v28 = vpop.f32.mrb[19].mxu0  ;;  %v800_v37 = vld [vmem:[#allocation2 + $0x28] sm:$0xff] }
 0x11b   : > { %807 = vrot.lane.b32.xlu1 %v694_v14, %s1475_s24  ;;  %837 = vrot.lane.b32.xlu0 %v826_v24, %s1476_s25 }
 0x11e   : > { %v1339_v31 = vpop.f32.mrb[20].mxu0  ;;  %v971_v32 = vpop.f32.mrb[20].mxu1 }
 0x11f   : > { %866 = vrot.lane.b32.xlu1 %v855_v29, %s1476_s25  ;;  %783 = vrot.lane.b32.xlu0 %v772_v30, %s1475_s24  ;;  %1037 = vst.msk [vmem:[#allocation2 + $0x40] sm:$0xff] %vm301_vm3, %v1339_v31  ;;  %v1014_v33 = vpop.f32.mrb[21].mxu0  ;;  %v973_v34 = vpop.f32.mrb[21].mxu1 }
 0x120   : > { %1031 = vst.msk [vmem:[#allocation2 + $0x10] sm:$0xff] %vm301_vm3, %v1014_v33  ;;  %v1340_v35 = vpop.f32.mrb[22].mxu0  ;;  %v975_v36 = vpop.f32.mrb[22].mxu1 }
 0x121   : > { %1040 = vst.msk [vmem:[#allocation2 + $0x58] sm:$0xff] %vm301_vm3, %v1340_v35  ;;  %v1017_v38 = vpop.f32.mrb[23].mxu0  ;;  %v977_v39 = vpop.f32.mrb[23].mxu1 }
 0x122   : > { %1034 = vst.msk [vmem:[#allocation2 + $0x28] sm:$0xff] %vm301_vm3, %v1017_v38 }
 0x123   : > { %811 = vrot.lane.b32.xlu1 %v800_v37, %s1475_s24  ;;  %809 = vrot.lane.b32.xlu0 %v696_v17, %s1475_s24 }
 0x126   : > { %v1095_v42 = vld [vmem:[#allocation2 + $0x40] sm:$0xff] }
 0x127   : > { %1052 = vrot.lane.b32.xlu1 %v963_v22, %s1475_s24  ;;  %1050 = vrot.lane.b32.xlu0 %v961_v20, %s1475_s24  ;;  %v1043_v41 = vld [vmem:[#allocation2 + $0x10] sm:$0xff] }
 0x128   : > { %v1121_v43 = vld [vmem:[#allocation2 + $0x58] sm:$0xff] }
 0x129   : > { %v1069_v40 = vld [vmem:[#allocation2 + $0x28] sm:$0xff] }
 0x12b   : > { %835 = vrot.lane.b32.xlu1 %v702_v23, %s1476_s25  ;;  %833 = vrot.lane.b32.xlu0 %v700_v21, %s1476_s25 }
 0x12f   : > { %1076 = vrot.lane.b32.xlu1 %v965_v25, %s1475_s24  ;;  %1078 = vrot.lane.b32.xlu0 %v967_v27, %s1475_s24 }
 0x133   : > { %862 = vrot.lane.b32.xlu1 %v704_v26, %s1476_s25  ;;  %864 = vrot.lane.b32.xlu0 %v706_v28, %s1476_s25 }
 0x137   : > { %1080 = vrot.lane.b32.xlu1 %v1069_v40, %s1475_s24  ;;  %1054 = vrot.lane.b32.xlu0 %v1043_v41, %s1475_s24 }
 0x13b   : > { %1104 = vrot.lane.b32.xlu1 %v973_v34, %s1476_s25  ;;  %1102 = vrot.lane.b32.xlu0 %v971_v32, %s1476_s25 }
 0x13f   : > { %1128 = vrot.lane.b32.xlu1 %v975_v36, %s1476_s25  ;;  %1106 = vrot.lane.b32.xlu0 %v1095_v42, %s1476_s25 }
 0x143   : > { %1132 = vrot.lane.b32.xlu1 %v1121_v43, %s1476_s25  ;;  %1130 = vrot.lane.b32.xlu0 %v977_v39, %s1476_s25 }
 0x171   : > { %v339_v45 = vpop.permute.xlu1 %338  ;;  %v335_v47 = vpop.permute.xlu0 %334 }
 0x172   : > { %v346_v49 = vadd.f32 %v335_v47, %v1612_v44  ;;  %v359_v44 = vld [vmem:[#allocation3 + $0x28] sm:$0xff] }
 0x174   : > { %350 = vst.msk [vmem:[#allocation3] sm:$0xff] %vm349_vm4, %v346_v49 }
 0x175   : > { %v368_v51 = vpop.permute.xlu1 %367  ;;  %v337_v52 = vpop.permute.xlu0 %336 }
 0x176   : > { %v342_v55 = vsel %vm340_vm5, %v337_v52, %v339_v45  ;;  %v341_v30 = vsel %vm340_vm5, %v335_v47, %v337_v52 }
 0x177   : > { %v348_v57 = vadd.f32 %v342_v55, %v330_v54  ;;  %v347_v36 = vadd.f32 %v341_v30, %v1615_v46 }
 0x179   : > { %v1691_v58 = vpop.permute.xlu1 %363  ;;  %353 = vst.msk [vmem:[#allocation3 + $0x10] sm:$0xff] %vm352_vm6, %v348_v57  ;;  %v1694_v60 = vpop.permute.xlu0 %365 }
 0x17a   : > { %v374_v62 = vadd.f32 %v1691_v58, %v1619_v48  ;;  %v370_v63 = vsel %vm340_vm5, %v1694_v60, %v368_v51  ;;  %v369_v46 = vsel %vm340_vm5, %v1691_v58, %v1694_v60 }
 0x17b   : > { %v376_v0 = vadd.f32 %v370_v63, %v359_v44  ;;  %v773_v13 = vld [vmem:[#allocation3] sm:$0xff] }
 0x17c   : > { %377 = vst.msk [vmem:[#allocation3 + $0x18] sm:$0xff] %vm349_vm4, %v374_v62  ;;  %v375_v62 = vadd.f32 %v369_v46, %v1622_v50 }
 0x17d   : > { %379 = vst.msk [vmem:[#allocation3 + $0x28] sm:$0xff] %vm352_vm6, %v376_v0  ;;  %v1702_v1 = vpop.permute.xlu1 %567  ;;  %v1704_v2 = vpop.permute.xlu0 %565 }
 0x17e   : > { %v576_v3 = vadd.f32 %v1704_v2, %v1626_v53  ;;  %v587_v53 = vld [vmem:[#allocation3 + $0x58] sm:$0xff]  ;;  %v571_v50 = vsel %vm340_vm5, %v1704_v2, %v1702_v1 }
 0x17f   : > { %v577_v2 = vadd.f32 %v571_v50, %v1629_v56 }
 0x180   : > { %579 = vst.msk [vmem:[#allocation3 + $0x30] sm:$0xff] %vm349_vm4, %v576_v3  ;;  %v775_v22 = vld [vmem:[#allocation3 + $0x10] sm:$0xff] }
 0x181   : > { %v1709_v4 = vpop.permute.xlu1 %591  ;;  %v570_v48 = vpop.permute.xlu0 %569 }
 0x182   : > { %v602_v5 = vadd.f32 %v1709_v4, %v1633_v59  ;;  %v572_v7 = vsel %vm340_vm5, %v1702_v1, %v570_v48 }
 0x183   : > { %v578_v8 = vadd.f32 %v572_v7, %v561_v6  ;;  %v801_v16 = vld [vmem:[#allocation3 + $0x18] sm:$0xff] }
 0x184   : > { %605 = vst.msk [vmem:[#allocation3 + $0x48] sm:$0xff] %vm349_vm4, %v602_v5  ;;  %v803_v27 = vld [vmem:[#allocation3 + $0x28] sm:$0xff] }
 0x185   : > { %581 = vst.msk [vmem:[#allocation3 + $0x40] sm:$0xff] %vm352_vm6, %v578_v8  ;;  %v596_v9 = vpop.permute.xlu1 %595  ;;  %v1717_v10 = vpop.permute.xlu0 %593 }
 0x186   : > { %v598_v11 = vsel %vm340_vm5, %v1717_v10, %v596_v9  ;;  %v597_v56 = vsel %vm340_vm5, %v1709_v4, %v1717_v10 }
 0x187   : > { %v604_v12 = vadd.f32 %v598_v11, %v587_v53  ;;  %v1044_v32 = vld [vmem:[#allocation3 + $0x30] sm:$0xff] }
 0x189   : > { %607 = vst.msk [vmem:[#allocation3 + $0x58] sm:$0xff] %vm352_vm6, %v604_v12  ;;  %v782_v59 = vpop.permute.xlu1 %781  ;;  %v780_v14 = vpop.permute.xlu0 %779 }
 0x18a   : > { %v790_v15 = vadd.f32 %v780_v14, %v773_v13  ;;  %v785_v34 = vsel %vm352_vm6, %v780_v14, %v782_v59 }
 0x18b   : > { %v791_v37 = vadd.f32 %v785_v34, %v347_v36  ;;  %v1070_v51 = vld [vmem:[#allocation3 + $0x48] sm:$0xff] }
 0x18c   : > { %794 = vst.msk [vmem:[#allocation3] sm:$0xff] %vm793_vm7, %v790_v15  ;;  %v1046_v14 = vld [vmem:[#allocation3 + $0x40] sm:$0xff] }
 0x18d   : > { %v808_v17 = vpop.permute.xlu1 %807  ;;  %v838_v18 = vpop.permute.xlu0 %837 }
 0x18e   : > { %v818_v19 = vadd.f32 %v808_v17, %v801_v16 }
 0x190   : > { %821 = vst.msk [vmem:[#allocation3 + $0x18] sm:$0xff] %vm793_vm7, %v818_v19 }
 0x191   : > { %v867_v20 = vpop.permute.xlu1 %866  ;;  %v784_v21 = vpop.permute.xlu0 %783 }
 0x192   : > { %v786_v23 = vsel %vm352_vm6, %v782_v59, %v784_v21  ;;  %v1072_v59 = vld [vmem:[#allocation3 + $0x58] sm:$0xff] }
 0x193   : > { %v792_v24 = vadd.f32 %v786_v23, %v775_v22  ;;  %v827_v39 = vld [vmem:[#allocation3] sm:$0xff] }
 0x195   : > { %797 = vst.msk [vmem:[#allocation3 + $0x10] sm:$0xff] %vm796_vm8, %v792_v24  ;;  %v812_v25 = vpop.permute.xlu1 %811  ;;  %v810_v26 = vpop.permute.xlu0 %809 }
 0x196   : > { %v814_v28 = vsel %vm352_vm6, %v810_v26, %v812_v25  ;;  %v813_v55 = vsel %vm352_vm6, %v808_v17, %v810_v26 }
 0x197   : > { %v820_v29 = vadd.f32 %v814_v28, %v803_v27  ;;  %v819_v58 = vadd.f32 %v813_v55, %v375_v62  ;;  %v856_v60 = vld [vmem:[#allocation3 + $0x18] sm:$0xff] }
 0x199   : > { %823 = vst.msk [vmem:[#allocation3 + $0x28] sm:$0xff] %vm796_vm8, %v820_v29  ;;  %v1053_v31 = vpop.permute.xlu1 %1052  ;;  %v1051_v33 = vpop.permute.xlu0 %1050 }
 0x19a   : > { %v1061_v35 = vadd.f32 %v1051_v33, %v1044_v32  ;;  %v1056_v12 = vsel %vm352_vm6, %v1051_v33, %v1053_v31 }
 0x19b   : > { %v1062_v17 = vadd.f32 %v1056_v12, %v577_v2 }
 0x19c   : > { %1064 = vst.msk [vmem:[#allocation3 + $0x30] sm:$0xff] %vm793_vm7, %v1061_v35  ;;  %v829_v41 = vld [vmem:[#allocation3 + $0x10] sm:$0xff] }
 0x19d   : > { %v836_v38 = vpop.permute.xlu1 %835  ;;  %v834_v40 = vpop.permute.xlu0 %833 }
 0x19e   : > { %v841_v42 = vsel %vm839_vm9, %v836_v38, %v838_v18  ;;  %v840_v43 = vsel %vm839_vm9, %v834_v40, %v836_v38  ;;  %v845_v45 = vadd.f32 %v834_v40, %v827_v39 }
 0x19f   : > { %v847_v47 = vadd.f32 %v841_v42, %v829_v41  ;;  %v846_v49 = vadd.f32 %v840_v43, %v791_v37 }
 0x1a0   : > { %849 = vst.msk [vmem:[#allocation3] sm:$0xff] %vm848_vm10, %v845_v45  ;;  %v858_v3 = vld [vmem:[#allocation3 + $0x28] sm:$0xff] }
 0x1a1   : > { %852 = vst.msk [vmem:[#allocation3 + $0x10] sm:$0xff] %vm851_vm11, %v847_v47  ;;  %1149 = vst [vmem:[%s1742_s28 + $0x8] sm:$0xff] %v846_v49  ;;  %v1077_v52 = vpop.permute.xlu1 %1076  ;;  %v1079_v54 = vpop.permute.xlu0 %1078 }
 0x1a2   : > { %v1087_v57 = vadd.f32 %v1077_v52, %v1070_v51  ;;  %v1082_v29 = vsel %vm352_vm6, %v1077_v52, %v1079_v54 }
 0x1a3   : > { %v1096_v19 = vld [vmem:[#allocation3 + $0x30] sm:$0xff] }
 0x1a4   : > { %1090 = vst.msk [vmem:[#allocation3 + $0x48] sm:$0xff] %vm793_vm7, %v1087_v57 }
 0x1a5   : > { %v863_v44 = vpop.permute.xlu1 %862  ;;  %v865_v63 = vpop.permute.xlu0 %864 }
 0x1a6   : > { %v873_v0 = vadd.f32 %v863_v44, %v856_v60  ;;  %v868_v48 = vsel %vm839_vm9, %v863_v44, %v865_v63  ;;  %v869_v5 = vsel %vm839_vm9, %v865_v63, %v867_v20 }
 0x1a7   : > { %v1145_v6 = vld [vmem:[#allocation3] sm:$0xff]  ;;  %v874_v7 = vadd.f32 %v868_v48, %v819_v58  ;;  %v875_v8 = vadd.f32 %v869_v5, %v858_v3 }
 0x1a8   : > { %v1147_v9 = vld [vmem:[#allocation3 + $0x10] sm:$0xff]  ;;  %1148 = vst [vmem:[%s1742_s28] sm:$0xff] %v1145_v6  ;;  %876 = vst.msk [vmem:[#allocation3 + $0x18] sm:$0xff] %vm848_vm10, %v873_v0 }
 0x1a9   : > { %1150 = vst.msk [vmem:[%s1742_s28 + $0x10] sm:$0xff] %vm796_vm8, %v1147_v9  ;;  %1294 = vst [vmem:[%s1742_s28 + $0x20] sm:$0xff] %v874_v7  ;;  %v1081_v53 = vpop.permute.xlu1 %1080  ;;  %v1055_v11 = vpop.permute.xlu0 %1054 }
 0x1aa   : > { %878 = vst.msk [vmem:[#allocation3 + $0x28] sm:$0xff] %vm851_vm11, %v875_v8  ;;  %v1083_v13 = vsel %vm352_vm6, %v1079_v54, %v1081_v53  ;;  %v1057_v1 = vsel %vm352_vm6, %v1053_v31, %v1055_v11  ;;  %v603_v31 = vadd.f32 %v597_v56, %v1636_v61 }
 0x1ab   : > { %v1089_v15 = vadd.f32 %v1083_v13, %v1072_v59  ;;  %v1063_v16 = vadd.f32 %v1057_v1, %v1046_v14  ;;  %v1122_v26 = vld [vmem:[#allocation3 + $0x48] sm:$0xff] }
 0x1ac   : > { %v1088_v32 = vadd.f32 %v1082_v29, %v603_v31 }
 0x1ad   : > { %1092 = vst.msk [vmem:[#allocation3 + $0x58] sm:$0xff] %vm796_vm8, %v1089_v15  ;;  %1066 = vst.msk [vmem:[#allocation3 + $0x40] sm:$0xff] %vm796_vm8, %v1063_v16  ;;  %v1105_v18 = vpop.permute.xlu1 %1104  ;;  %v1103_v20 = vpop.permute.xlu0 %1102 }
 0x1ae   : > { %v1108_v21 = vsel %vm839_vm9, %v1103_v20, %v1105_v18  ;;  %v1113_v22 = vadd.f32 %v1103_v20, %v1096_v19 }
 0x1af   : > { %v1151_v23 = vld [vmem:[#allocation3 + $0x18] sm:$0xff]  ;;  %v1114_v24 = vadd.f32 %v1108_v21, %v1062_v17 }
 0x1b0   : > { %1293 = vst [vmem:[%s1742_s28 + $0x18] sm:$0xff] %v1151_v23  ;;  %1116 = vst.msk [vmem:[#allocation3 + $0x30] sm:$0xff] %vm848_vm10, %v1113_v22 }
 0x1b1   : > { %v1153_v25 = vld [vmem:[#allocation3 + $0x28] sm:$0xff]  ;;  %1297 = vst [vmem:[%s1742_s28 + $0x38] sm:$0xff] %v1114_v24  ;;  %v1129_v27 = vpop.permute.xlu1 %1128  ;;  %v1107_v28 = vpop.permute.xlu0 %1106 }
 0x1b2   : > { %1295 = vst.msk [vmem:[%s1742_s28 + $0x28] sm:$0xff] %vm796_vm8, %v1153_v25  ;;  %v1139_v30 = vadd.f32 %v1129_v27, %v1122_v26  ;;  %v1109_v10 = vsel %vm839_vm9, %v1105_v18, %v1107_v28 }
 0x1b4   : > { %1142 = vst.msk [vmem:[#allocation3 + $0x48] sm:$0xff] %vm848_vm10, %v1139_v30  ;;  %v1098_v4 = vld [vmem:[#allocation3 + $0x40] sm:$0xff]  ;;  %v1124_v36 = vld [vmem:[#allocation3 + $0x58] sm:$0xff] }
 0x1b5   : > { %v1115_v33 = vadd.f32 %v1109_v10, %v1098_v4  ;;  %v1133_v34 = vpop.permute.xlu1 %1132  ;;  %v1131_v35 = vpop.permute.xlu0 %1130 }
 0x1b6   : > { %v1134_v37 = vsel %vm839_vm9, %v1129_v27, %v1131_v35  ;;  %v1135_v38 = vsel %vm839_vm9, %v1131_v35, %v1133_v34 }
 0x1b7   : > { %v1158_v61 = vld [vmem:[#allocation3 + $0x30] sm:$0xff]  ;;  %1118 = vst.msk [vmem:[#allocation3 + $0x40] sm:$0xff] %vm851_vm11, %v1115_v33  ;;  %v1140_v39 = vadd.f32 %v1134_v37, %v1088_v32  ;;  %v1141_v40 = vadd.f32 %v1135_v38, %v1124_v36 }
 0x1b8   : > { %1296 = vst [vmem:[%s1742_s28 + $0x30] sm:$0xff] %v1158_v61 }
 0x1b9   : > { %1144 = vst.msk [vmem:[#allocation3 + $0x58] sm:$0xff] %vm851_vm11, %v1141_v40  ;;  %1300 = vst [vmem:[%s1742_s28 + $0x50] sm:$0xff] %v1140_v39 }
 0x1bb   : > { %v1165_v41 = vld [vmem:[#allocation3 + $0x48] sm:$0xff] }
 0x1bc   : > { %1299 = vst [vmem:[%s1742_s28 + $0x48] sm:$0xff] %v1165_v41 }
 0x1be   : > { %v1160_v42 = vld [vmem:[#allocation3 + $0x40] sm:$0xff] }
 0x1bf   : > { %1298 = vst.msk [vmem:[%s1742_s28 + $0x40] sm:$0xff] %vm796_vm8, %v1160_v42 }
 0x1c0   : > { %v1167_v43 = vld [vmem:[#allocation3 + $0x58] sm:$0xff] }
 0x1c1   : > { %1301 = vst.msk [vmem:[%s1742_s28 + $0x58] sm:$0xff] %vm796_vm8, %v1167_v43 }
 0x1c2   : > { %1420 = shalt.err (!%p1417_p3)
}
 0x1c3   : > { %s1421_s16 = scalar_lea.hbm %s1790_s5, 1536  ;;  %s1425_s22 = scalar_lea.hbm %s1843_s2, 3072 }
 0x1c4   : > { %p1422_p4 = scmp.ne.s32.totalorder %s1790_s5, %s1421_s16  ;;  %p1426_p9 = scmp.lt.u32.totalorder %s1790_s5, %s1843_s2 }
 0x1c5   : > { %p1427_p10 = scmp.lt.u32.totalorder %s1425_s22, %s1421_s16  ;;  %p1429_p12 = scmp.lt.u32.totalorder %s1421_s16, %s1790_s5 }
 0x1c6   : > { %p1423_p7 = pnand %p1422_p4, %p1533_p5 }
 0x1c7   : > { %p1428_p11 = por %p1427_p10, %p1426_p9 }
 0x1c8   : > { %p1424_p8 = pneg %p1423_p7 }
 0x1c9   : > { %p1430_p13 = por %p1429_p12, %p1428_p11 }
 0x1cb   : > { %p1431_p0 = pnand %p1430_p13, %p1424_p8 }
 0x1cd   : > { %1434 = shalt.err (!%p1431_p0)
}
 0x1ce   : > { %s1478_s25 = smov 384   ;;  %s1479_s26 = smov 24  }
 0x1cf   : > { %1348 = dma.vmem_to_hbm [thread:$0]  (%p1533_p5), %s1792_s30, 1536, %s1790_s5, %s1800_s13, %s1478_s25, %s1478_s25, %s1479_s26  }
 0x1d0 PF: > { %p1354_p1 = scmp.ge.s32.totalorder %s1469_s12, 2  ;;  %s1201_s27 = sand.u32 1, %s1457_s9  }
 0x1d1   : > { %s1202_s28 = scalar_lea.sflag [#allocation5], %s1201_s27 }
 0x1d2   : > { %p1351_p2 = pnand %p1354_p1, %p1537_p6 }
 0x1d4   : > { %1452 = dma.done.wait (!%p1351_p2), %s1202_s28, 1536  }
 0x1d5   : > { %1454 = vsyncadd (!%p1351_p2), %s1202_s28, 4294965760  ;;  %p12_p3 = scmp.ge.s32.totalorder %s1520_s15, 4   ;;  %s1846_s9 = smov %s1461_s10 }
 0x1d6   : > { %s1847_s10 = smov %s1465_s11  ;;  %s1848_s11 = smov %s1531_s18 }
 0x1d7   : > { %s1849_s12 = smov %s1520_s15  ;;  %14 = sbr.rel (!%p12_p3) target bundleno = 3 (0x3), region = 72 }
 0x1de   :  { %1207 = vsyncpa [#allocation5], 1 }
 0x1df   :  { %1209 = vsyncpa [#allocation5 + $0x1], 1 }

</bundles_post_ra>
